<compile_context>
chip_gen: v6e
topology: v6e:2x2x1
jax: 0.10.0
libtpu: 0.0.40
codegen_flags: <defaults>
</compile_context>

<pallas_src>
import jax
import jax.numpy as jnp
from jax.experimental import pallas as pl
from jax.experimental.pallas import tpu as pltpu


def attention_kernel(enc_ref, dec_ref, wf_ref, bf_ref, we_ref, be_ref, wc_ref,
                     attnw_ref, alpha_ref):
    TB, N, E = enc_ref.shape
    A = wf_ref.shape[1]

    enc = enc_ref[...]                                   # (TB, N, E)  bf16
    dec = dec_ref[...]                                   # (TB, D)     bf16

    # attn_features(encoder_out): one MXU matmul over all TB*N rows, f32 accumulation.
    enc2d = enc.reshape(TB * N, E)
    attn_f = jnp.dot(enc2d, wf_ref[...],
                     preferred_element_type=jnp.float32) + bf_ref[...]      # (TB*N, A) f32

    # attn_embeddings(decoder_out): (TB, D) @ (D, A), f32 accumulation.
    attn_e = jnp.dot(dec, we_ref[...],
                     preferred_element_type=jnp.float32) + be_ref[...]      # (TB, A) f32

    # broadcast add + relu (f32)
    h = jnp.maximum(attn_f.reshape(TB, N, A) + attn_e[:, None, :], 0.0)     # (TB, N, A)

    # attn_complete: reduce over A against the wc row -> scores with N on the lane axis.
    # (bias bc omitted: softmax is shift invariant, raw scores are never output)
    scores = jnp.sum(h * wc_ref[...][None], axis=-1)                        # (TB, N) f32

    # Lane-dense f32 softmax over N; divide replaced by EUP reciprocal.
    m = jnp.max(scores, axis=-1, keepdims=True)
    e = jnp.exp(scores - m)
    denom = jnp.sum(e, axis=-1, keepdims=True)
    alpha = e * pl.reciprocal(denom, approx=True)                           # (TB, N) f32
    alpha_ref[...] = alpha

    # (encoder_out * alpha).sum(dim=1) as a batched (1, N)@(N, E) bf16 MXU matmul
    # with f32 accumulation.
    attnw = jnp.einsum('bqn,bne->bqe',
                       alpha[:, None, :].astype(enc.dtype), enc,
                       preferred_element_type=jnp.float32)                  # (TB, 1, E) f32
    attnw_ref[...] = attnw[:, 0, :]


def _round8(x):
    return max(8, (x // 8) * 8)


def _select_tiling(B, N, E, D, A, enc_itemsize):
    """VMEM-budget-driven batch tile + per-generation scoped-VMEM limit."""
    try:
        phys_vmem = int(pltpu.get_tpu_info().vmem_capacity_bytes)   # 128 MiB v5e/v6e, 64 MiB/TC v7x
    except Exception:
        phys_vmem = 64 << 20                                        # conservative (v7x per-TC)

    budget = int(phys_vmem * 0.6)        # headroom for weights / compiler scratch / spills
    vmem_limit = int(phys_vmem * 0.85)

    # Per-batch-row VMEM bytes of one grid step:
    #   2x double-buffered encoder tile + 2x double-buffered outputs (f32)
    #   + (TB,N,A) intermediates attn_f and relu-h (f32) + decoder tile + score temps.
    per_row = (2 * N * E * enc_itemsize        # encoder_out tile (double buffered)
               + 2 * (E + N) * 4               # attn_weighted + alpha outputs (double buffered)
               + 2 * N * A * 4                 # attn_f + h intermediates (f32)
               + 2 * D * enc_itemsize          # decoder tile (double buffered)
               + 4 * N * 4)                    # scores / exp / alpha temporaries

    block_b = _round8(budget // per_row)

    B8 = -(-B // 8) * 8
    block_b = min(block_b, B8)
    # Keep >= 2 grid steps along the "parallel" batch axis so both v7x TensorCores
    # get work (negligible extra cost on single-TC v5e/v6e).
    if B8 >= 16:
        block_b = min(block_b, _round8(B8 // 2))
    return block_b, vmem_limit


def attention_forward(encoder_out, decoder_out, params, *, block_b=None,
                      compute_dtype=jnp.bfloat16):
    """encoder_out: (B, N, E); decoder_out: (B, D).  Returns (attn_weighted, alpha) in f32."""
    B, N, E = encoder_out.shape
    D = decoder_out.shape[1]
    wf, bf, we, be, wc, bc = params          # wf:(E,A) bf:(1,A) we:(D,A) be:(1,A) wc:(A,1) bc:(1,1)
    A = wf.shape[1]

    # bf16 inputs/weights (halves HBM traffic on this memory-bound kernel); biases + the
    # attn_complete row stay f32 since they are added / applied after f32 accumulation.
    enc_c = encoder_out.astype(compute_dtype)
    dec_c = decoder_out.astype(compute_dtype)
    wf_c = wf.astype(compute_dtype)
    we_c = we.astype(compute_dtype)
    bf_f = bf.astype(jnp.float32)
    be_f = be.astype(jnp.float32)
    wc_row = wc.reshape(1, A).astype(jnp.float32)

    enc_itemsize = jnp.dtype(compute_dtype).itemsize
    auto_block_b, vmem_limit = _select_tiling(B, N, E, D, A, enc_itemsize)
    if block_b is None:
        block_b = auto_block_b

    Bp = -(-B // block_b) * block_b
    if Bp != B:
        # Zero-padded batch rows produce a uniform (finite) alpha and are sliced off below.
        enc_c = jnp.pad(enc_c, ((0, Bp - B), (0, 0), (0, 0)))
        dec_c = jnp.pad(dec_c, ((0, Bp - B), (0, 0)))

    grid = (Bp // block_b,)

    attn_w, alpha = pl.pallas_call(
        attention_kernel,
        out_shape=(
            jax.ShapeDtypeStruct((Bp, E), jnp.float32),
            jax.ShapeDtypeStruct((Bp, N), jnp.float32),
        ),
        grid_spec=pltpu.PrefetchScalarGridSpec(
            num_scalar_prefetch=0,
            grid=grid,
            in_specs=[
                pl.BlockSpec((block_b, N, E), lambda b: (b, 0, 0)),   # encoder_out tile (bf16)
                pl.BlockSpec((block_b, D), lambda b: (b, 0)),         # decoder_out tile (bf16)
                pl.BlockSpec((E, A), lambda b: (0, 0)),               # Wf (pre-transposed, bf16)
                pl.BlockSpec((1, A), lambda b: (0, 0)),               # bf (f32)
                pl.BlockSpec((D, A), lambda b: (0, 0)),               # We (pre-transposed, bf16)
                pl.BlockSpec((1, A), lambda b: (0, 0)),               # be (f32)
                pl.BlockSpec((1, A), lambda b: (0, 0)),               # Wc row (f32)
            ],
            out_specs=[
                pl.BlockSpec((block_b, E), lambda b: (b, 0)),         # attn_weighted (lane-dense)
                pl.BlockSpec((block_b, N), lambda b: (b, 0)),         # alpha (lane-dense)
            ],
        ),
        compiler_params=pltpu.CompilerParams(
            dimension_semantics=("parallel",),
            vmem_limit_bytes=vmem_limit,
        ),
    )(enc_c, dec_c, wf_c, bf_f, we_c, be_f, wc_row)

    return attn_w[:B], alpha[:B]


def reference_forward(encoder_out, decoder_out, params):
    wf, bf, we, be, wc, bc = params
    attn = encoder_out @ wf + bf + (decoder_out @ we + be)[:, None, :]
    scores = (jnp.maximum(attn, 0.0) @ wc + bc)[..., 0]          # (B, N)
    alpha = jax.nn.softmax(scores, axis=1)
    attn_weighted = (encoder_out * alpha[..., None]).sum(axis=1)
    return attn_weighted, alpha


if __name__ == "__main__":
    B, N = 2, 16
    E, D, A = 32, 32, 32   # encoder_size, decoder_size, attention_size

    key = jax.random.PRNGKey(0)
    k_enc, k_dec, k_wf, k_bf, k_we, k_be, k_wc, k_bc = jax.random.split(key, 8)

    encoder_out = jax.random.normal(k_enc, (B, N, E), dtype=jnp.float32)
    decoder_out = jax.random.normal(k_dec, (B, D), dtype=jnp.float32)

    # PyTorch Linear weights, stored pre-transposed as (in, out).
    wf = jax.random.normal(k_wf, (E, A), dtype=jnp.float32) * 0.1
    bf = jax.random.normal(k_bf, (1, A), dtype=jnp.float32) * 0.1
    we = jax.random.normal(k_we, (D, A), dtype=jnp.float32) * 0.1
    be = jax.random.normal(k_be, (1, A), dtype=jnp.float32) * 0.1
    wc = jax.random.normal(k_wc, (A, 1), dtype=jnp.float32) * 0.1
    bc = jax.random.normal(k_bc, (1, 1), dtype=jnp.float32) * 0.1
    params = (wf, bf, we, be, wc, bc)

    attn_w, alpha = attention_forward(encoder_out, decoder_out, params)
    jax.block_until_ready((attn_w, alpha))

    ref_w, ref_a = reference_forward(encoder_out, decoder_out, params)
    # Tolerances loosened for the bf16 input / f32-accumulation compute path.
    assert jnp.allclose(attn_w, ref_w, atol=3e-2, rtol=3e-2), \
        float(jnp.abs(attn_w - ref_w).max())
    assert jnp.allclose(alpha, ref_a, atol=3e-2, rtol=3e-2), \
        float(jnp.abs(alpha - ref_a).max())

    print("KERNEL_OK")
</pallas_src>

<mosaic_0001>
module attributes {stable_mosaic.version = 11 : i64} {
  func.func @attention_kernel(%arg0: i32, %arg1: memref<8x16x32xbf16, #tpu.memory_space<vmem>>, %arg2: memref<8x32xbf16, #tpu.memory_space<vmem>>, %arg3: memref<32x32xbf16, #tpu.memory_space<vmem>>, %arg4: memref<1x32xf32, #tpu.memory_space<vmem>>, %arg5: memref<32x32xbf16, #tpu.memory_space<vmem>>, %arg6: memref<1x32xf32, #tpu.memory_space<vmem>>, %arg7: memref<1x32xf32, #tpu.memory_space<vmem>>, %arg8: memref<8x32xf32, #tpu.memory_space<vmem>>, %arg9: memref<8x16xf32, #tpu.memory_space<vmem>>) attributes {dimension_semantics = [#tpu.dimension_semantics<parallel>], iteration_bounds = array<i64: 1>, scalar_prefetch = 0 : i64, scratch_operands = 0 : i64, tpu.core_type = #tpu.core_type<tc>, window_params = [{transform_indices = @transform_0, window_bounds = array<i64: 8, 16, 32>}, {transform_indices = @transform_1, window_bounds = array<i64: 8, 32>}, {pipeline_mode = #tpu.pipeline_mode<synchronous>, transform_indices = @transform_2, window_bounds = array<i64: 32, 32>}, {pipeline_mode = #tpu.pipeline_mode<synchronous>, transform_indices = @transform_3, window_bounds = array<i64: 1, 32>}, {pipeline_mode = #tpu.pipeline_mode<synchronous>, transform_indices = @transform_4, window_bounds = array<i64: 32, 32>}, {pipeline_mode = #tpu.pipeline_mode<synchronous>, transform_indices = @transform_5, window_bounds = array<i64: 1, 32>}, {pipeline_mode = #tpu.pipeline_mode<synchronous>, transform_indices = @transform_6, window_bounds = array<i64: 1, 32>}, {transform_indices = @transform_7, window_bounds = array<i64: 8, 32>}, {transform_indices = @transform_8, window_bounds = array<i64: 8, 16>}]} {
    %c0 = arith.constant 0 : index
    %c0_0 = arith.constant 0 : index
    %c0_1 = arith.constant 0 : index
    %0 = vector.load %arg1[%c0, %c0_0, %c0_1] : memref<8x16x32xbf16, #tpu.memory_space<vmem>>, vector<8x16x32xbf16>
    %c0_2 = arith.constant 0 : index
    %c0_3 = arith.constant 0 : index
    %1 = vector.load %arg2[%c0_2, %c0_3] : memref<8x32xbf16, #tpu.memory_space<vmem>>, vector<8x32xbf16>
    %2 = vector.shape_cast %0 : vector<8x16x32xbf16> to vector<128x32xbf16>
    %c0_4 = arith.constant 0 : index
    %c0_5 = arith.constant 0 : index
    %3 = vector.load %arg3[%c0_4, %c0_5] : memref<32x32xbf16, #tpu.memory_space<vmem>>, vector<32x32xbf16>
    %cst = arith.constant dense<0.000000e+00> : vector<128x32xf32>
    %4 = tpu.matmul %2, %3, %cst {dimension_numbers = #tpu.dot_dimension_numbers<[1], [0], [0], [1], [0, 0, 1, 1], [], []>} : vector<128x32xbf16>, vector<32x32xbf16>, vector<128x32xf32> -> vector<128x32xf32>
    %c0_6 = arith.constant 0 : index
    %c0_7 = arith.constant 0 : index
    %5 = vector.load %arg4[%c0_6, %c0_7] : memref<1x32xf32, #tpu.memory_space<vmem>>, vector<1x32xf32>
    %6 = vector.broadcast %5 : vector<1x32xf32> to vector<128x32xf32>
    %7 = arith.addf %4, %6 : vector<128x32xf32>
    %c0_8 = arith.constant 0 : index
    %c0_9 = arith.constant 0 : index
    %8 = vector.load %arg5[%c0_8, %c0_9] : memref<32x32xbf16, #tpu.memory_space<vmem>>, vector<32x32xbf16>
    %cst_10 = arith.constant dense<0.000000e+00> : vector<8x32xf32>
    %9 = tpu.matmul %1, %8, %cst_10 {dimension_numbers = #tpu.dot_dimension_numbers<[1], [0], [0], [1], [0, 0, 1, 1], [], []>} : vector<8x32xbf16>, vector<32x32xbf16>, vector<8x32xf32> -> vector<8x32xf32>
    %c0_11 = arith.constant 0 : index
    %c0_12 = arith.constant 0 : index
    %10 = vector.load %arg6[%c0_11, %c0_12] : memref<1x32xf32, #tpu.memory_space<vmem>>, vector<1x32xf32>
    %11 = vector.broadcast %10 : vector<1x32xf32> to vector<8x32xf32>
    %12 = arith.addf %9, %11 : vector<8x32xf32>
    %13 = vector.shape_cast %7 : vector<128x32xf32> to vector<8x16x32xf32>
    %14 = vector.shape_cast %12 : vector<8x32xf32> to vector<8x1x32xf32>
    %15 = vector.broadcast %14 : vector<8x1x32xf32> to vector<8x16x32xf32>
    %16 = arith.addf %13, %15 : vector<8x16x32xf32>
    %cst_13 = arith.constant 0.000000e+00 : f32
    %17 = vector.broadcast %cst_13 : f32 to vector<8x16x32xf32>
    %18 = arith.maximumf %16, %17 : vector<8x16x32xf32>
    %c0_14 = arith.constant 0 : index
    %c0_15 = arith.constant 0 : index
    %19 = vector.load %arg7[%c0_14, %c0_15] : memref<1x32xf32, #tpu.memory_space<vmem>>, vector<1x32xf32>
    %20 = vector.shape_cast %19 : vector<1x32xf32> to vector<1x1x32xf32>
    %21 = vector.broadcast %20 : vector<1x1x32xf32> to vector<8x16x32xf32>
    %22 = arith.mulf %18, %21 : vector<8x16x32xf32>
    %cst_16 = arith.constant dense<0.000000e+00> : vector<8x16xf32>
    %23 = vector.multi_reduction <add>, %22, %cst_16 [2] : vector<8x16x32xf32> to vector<8x16xf32>
    %cst_17 = arith.constant dense<0xFF800000> : vector<8xf32>
    %24 = vector.multi_reduction <maximumf>, %23, %cst_17 [1] : vector<8x16xf32> to vector<8xf32>
    %25 = vector.shape_cast %24 : vector<8xf32> to vector<8x1xf32>
    %26 = vector.broadcast %25 : vector<8x1xf32> to vector<8x16xf32>
    %27 = arith.subf %23, %26 : vector<8x16xf32>
    %28 = math.exp %27 : vector<8x16xf32>
    %cst_18 = arith.constant dense<0.000000e+00> : vector<8xf32>
    %29 = vector.multi_reduction <add>, %28, %cst_18 [1] : vector<8x16xf32> to vector<8xf32>
    %30 = vector.shape_cast %29 : vector<8xf32> to vector<8x1xf32>
    %31 = tpu.reciprocal %30 {approx = true} : vector<8x1xf32> -> vector<8x1xf32>
    %32 = vector.broadcast %31 : vector<8x1xf32> to vector<8x16xf32>
    %33 = arith.mulf %28, %32 : vector<8x16xf32>
    %c0_19 = arith.constant 0 : index
    %c0_20 = arith.constant 0 : index
    %34 = vector.load %arg9[%c0_19, %c0_20] : memref<8x16xf32, #tpu.memory_space<vmem>>, vector<8x16xf32>
    tpu.vector_store %arg9[%c0_19, %c0_20], %33 {strides = array<i32>} : memref<8x16xf32, #tpu.memory_space<vmem>>, vector<8x16xf32>,
    %35 = vector.shape_cast %33 : vector<8x16xf32> to vector<8x1x16xf32>
    %36 = arith.truncf %35 : vector<8x1x16xf32> to vector<8x1x16xbf16>
    "tpu.trace_start"() <{level = 10 : i32, message = "bqn,bne->bqe"}> : () -> ()
    %cst_21 = arith.constant dense<0.000000e+00> : vector<8x1x32xf32>
    %37 = tpu.matmul %36, %0, %cst_21 {dimension_numbers = #tpu.dot_dimension_numbers<[2], [1], [1], [2], [0, 0, 0, 1, 1, 2], [0], [0]>} : vector<8x1x16xbf16>, vector<8x16x32xbf16>, vector<8x1x32xf32> -> vector<8x1x32xf32>
    "tpu.trace_stop"() : () -> ()
    %38 = vector.shape_cast %37 : vector<8x1x32xf32> to vector<8x32xf32>
    %c0_22 = arith.constant 0 : index
    %c0_23 = arith.constant 0 : index
    %39 = vector.load %arg8[%c0_22, %c0_23] : memref<8x32xf32, #tpu.memory_space<vmem>>, vector<8x32xf32>
    tpu.vector_store %arg8[%c0_22, %c0_23], %38 {strides = array<i32>} : memref<8x32xf32, #tpu.memory_space<vmem>>, vector<8x32xf32>,
    return
  }
  func.func @transform_0(%arg0: i32) -> (i32, i32, i32) {
    %c0_i32 = arith.constant 0 : i32
    %c0_i32_0 = arith.constant 0 : i32
    %c0_i32_1 = arith.constant 0 : i32
    return %arg0, %c0_i32, %c0_i32_0 : i32, i32, i32
  }
  func.func @transform_1(%arg0: i32) -> (i32, i32) {
    %c0_i32 = arith.constant 0 : i32
    %c0_i32_0 = arith.constant 0 : i32
    return %arg0, %c0_i32 : i32, i32
  }
  func.func @transform_2(%arg0: i32) -> (i32, i32) {
    %c0_i32 = arith.constant 0 : i32
    %c0_i32_0 = arith.constant 0 : i32
    %c0_i32_1 = arith.constant 0 : i32
    return %c0_i32, %c0_i32_0 : i32, i32
  }
  func.func @transform_3(%arg0: i32) -> (i32, i32) {
    %c0_i32 = arith.constant 0 : i32
    %c0_i32_0 = arith.constant 0 : i32
    %c0_i32_1 = arith.constant 0 : i32
    return %c0_i32, %c0_i32_0 : i32, i32
  }
  func.func @transform_4(%arg0: i32) -> (i32, i32) {
    %c0_i32 = arith.constant 0 : i32
    %c0_i32_0 = arith.constant 0 : i32
    %c0_i32_1 = arith.constant 0 : i32
    return %c0_i32, %c0_i32_0 : i32, i32
  }
  func.func @transform_5(%arg0: i32) -> (i32, i32) {
    %c0_i32 = arith.constant 0 : i32
    %c0_i32_0 = arith.constant 0 : i32
    %c0_i32_1 = arith.constant 0 : i32
    return %c0_i32, %c0_i32_0 : i32, i32
  }
  func.func @transform_6(%arg0: i32) -> (i32, i32) {
    %c0_i32 = arith.constant 0 : i32
    %c0_i32_0 = arith.constant 0 : i32
    %c0_i32_1 = arith.constant 0 : i32
    return %c0_i32, %c0_i32_0 : i32, i32
  }
  func.func @transform_7(%arg0: i32) -> (i32, i32) {
    %c0_i32 = arith.constant 0 : i32
    %c0_i32_0 = arith.constant 0 : i32
    return %arg0, %c0_i32 : i32, i32
  }
  func.func @transform_8(%arg0: i32) -> (i32, i32) {
    %c0_i32 = arith.constant 0 : i32
    %c0_i32_0 = arith.constant 0 : i32
    return %arg0, %c0_i32 : i32, i32
  }
}

</mosaic_0001>

<bundles_post_ra>
// kernel: tpu_custom_call.1
= control target key start
LH: loop header
LB: loop body
LE: loop exit
PB: predicated region body
PF: predicated region fallthrough
CT: control target
= control target key end

     0   :  { %14 = vsyncpa [#allocation3], 0  ;;  %s2525_s0 = inlined_call_operand.hbm [shape: bf16[8,16,32], index: 0, kind: input, shape index: {}]   ;;  %s2526_s1 = inlined_call_operand.hbm [shape: bf16[8,32], index: 1, kind: input, shape index: {}]   ;;  %s2527_s2 = inlined_call_operand.hbm [shape: bf16[32,32], index: 2, kind: input, shape index: {}]   ;;  %s2528_s3 = inlined_call_operand.vmem [shape: f32[1,32], index: 3, kind: input, shape index: {}]   ;;  %s2529_s4 = inlined_call_operand.hbm [shape: bf16[32,32], index: 4, kind: input, shape index: {}]   ;;  %s2530_s5 = inlined_call_operand.vmem [shape: f32[1,32], index: 5, kind: input, shape index: {}]   ;;  %s2531_s6 = inlined_call_operand.vmem [shape: f32[1,32], index: 6, kind: input, shape index: {}]   ;;  %s2532_s7 = inlined_call_operand.hbm [shape: f32[8,32], index: 7, kind: output, shape index: {0}]   ;;  %s2533_s8 = inlined_call_operand.hbm [shape: f32[8,16], index: 8, kind: output, shape index: {1}]  }
   0x1   :  { %15 = vsyncpa [#allocation6], 0 }
   0x2   :  { %16 = vsyncpa [#allocation9], 0 }
   0x3   :  { %17 = vsyncpa [#allocation4], 0 }
   0x4   :  { %18 = vsyncpa [#allocation12], 0  ;;  %s1989_s27 = smov [#allocation5]   ;;  %s1990_s29 = smov [#allocation2]  }
   0x5   :  { %s37_s28 = sshll.u32 %s1989_s27, 4  ;;  %s24_s30 = sshll.u32 %s1990_s29, 4  ;;  %s38_s28 = int_to_ptr.vmem [resolvable:$true] %s37_s28  ;;  %s25_s30 = int_to_ptr.vmem [resolvable:$true] %s24_s30 }
   0x6   :  { %s1867_s9 = scalar_lea.vmem %s38_s28, 64  ;;  %p1872_p1 = scmp.lt.s32.totalorder %s38_s28, %s38_s28 }
   0x7   :  { %p1868_p0 = scmp.ne.s32.totalorder %s38_s28, %s1867_s9  ;;  %p1873_p2 = scmp.lt.s32.totalorder %s1867_s9, %s1867_s9 }
   0x9   :  { %p1874_p3 = por %p1873_p2, %p1872_p1 }
   0xb   :  { %p1875_p4 = pnand %p1874_p3, %p1868_p0 }
   0xd   :  { %1878 = shalt.err (!%p1875_p4)
}
   0xe   :  { %40 = dma.hbm_to_vmem [thread:$0]  %s2526_s1, 64, %s38_s28, [#allocation6]  }
   0xf   :  { %s1887_s12 = scalar_lea.vmem %s25_s30, 1024  ;;  %p1892_p6 = scmp.lt.s32.totalorder %s25_s30, %s25_s30 }
  0x10   :  { %p1888_p5 = scmp.ne.s32.totalorder %s25_s30, %s1887_s12  ;;  %p1893_p7 = scmp.lt.s32.totalorder %s1887_s12, %s1887_s12 }
  0x12   :  { %p1894_p8 = por %p1893_p7, %p1892_p6 }
  0x14   :  { %p1895_p9 = pnand %p1894_p8, %p1888_p5 }
  0x16   :  { %1898 = shalt.err (!%p1895_p9)
}
  0x17   :  { %s1991_s13 = smov 64   ;;  %s1992_s14 = smov 4  }
  0x18   :  { %30 = dma.hbm_to_vmem [thread:$0]  %s2525_s0, 1024, %s25_s30, [#allocation3], %s1991_s13, %s1991_s13, %s1992_s14  }
  0x19   :  { %s1993_s17 = smov [#allocation7]   ;;  %s1994_s19 = smov [#allocation8]  }
  0x1a   :  { %s46_s18 = sshll.u32 %s1993_s17, 4  ;;  %s60_s20 = sshll.u32 %s1994_s19, 4  ;;  %s47_s18 = int_to_ptr.vmem [resolvable:$true] %s46_s18  ;;  %s61_s20 = int_to_ptr.vmem [resolvable:$true] %s60_s20 }
  0x1b   :  { %s1907_s1 = scalar_lea.vmem %s47_s18, 256  ;;  %p1912_p11 = scmp.lt.s32.totalorder %s47_s18, %s47_s18 }
  0x1c   :  { %p1908_p10 = scmp.ne.s32.totalorder %s47_s18, %s1907_s1  ;;  %p1913_p12 = scmp.lt.s32.totalorder %s1907_s1, %s1907_s1 }
  0x1e   :  { %p1914_p13 = por %p1913_p12, %p1912_p11 }
  0x20   :  { %p1915_p0 = pnand %p1914_p13, %p1908_p10 }
  0x22   :  { %1918 = shalt.err (!%p1915_p0)
}
  0x23   :  { %52 = dma.hbm_to_vmem [thread:$0]  %s2527_s2, 256, %s47_s18, [#allocation6], %s1991_s13, %s1991_s13, %s1992_s14  }
  0x24   :  { %s1927_s23 = scalar_lea.vmem %s61_s20, 256  ;;  %p1932_p2 = scmp.lt.s32.totalorder %s61_s20, %s61_s20 }
  0x25   :  { %p1928_p1 = scmp.ne.s32.totalorder %s61_s20, %s1927_s23  ;;  %p1933_p3 = scmp.lt.s32.totalorder %s1927_s23, %s1927_s23 }
  0x27   :  { %p1934_p4 = por %p1933_p3, %p1932_p2 }
  0x29   :  { %p1935_p5 = pnand %p1934_p4, %p1928_p1 }
  0x2b   :  { %1938 = shalt.err (!%p1935_p5)
}
  0x2c   :  { %66 = dma.hbm_to_vmem [thread:$0]  %s2529_s4, 256, %s61_s20, [#allocation9], %s1991_s13, %s1991_s13, %s1992_s14  }
  0x2d   :  { %1979 = dma.done.wait [#allocation3], 1024  }
  0x2e   :  { %1980 = vsyncadd [#allocation3], 4294966272 }
  0x2f   :  { %1981 = dma.done.wait [#allocation6], 320  }
  0x30   :  { %1982 = vsyncadd [#allocation6], 4294966976 }
  0x31   :  { %1983 = dma.done.wait [#allocation9], 256  }
  0x32   :  { %1984 = vsyncadd [#allocation9], 4294967040  ;;  %v1995_v0 = vmov 0.0   ;;  %vm1996_vm0 = vmmov 0   ;;  %v1813_v1 = vld [vmem:[#allocation7 + $0x8] sm:$0xff]   ;;  %v1814_v2 = vld [vmem:[#allocation8 + $0x8] sm:$0xff]   ;;  %v357_v16 = vlaneseq }
  0x33   :  { %1743 = vmatprep.subr.bf16.mxu1 %v1995_v0  ;;  %1747 = vmatprep.mubr.msk.bf16.mxu1 %vm1996_vm0, %v1995_v0  ;;  %v1815_v3 = vld [vmem:[#allocation7] sm:$0xff]   ;;  %v1816_v4 = vld [vmem:[#allocation8] sm:$0xff]   ;;  %vm164_vm1 = vcmask 261120   ;;  %v100_v6 = vld [vmem:[#allocation5] sm:$0xf]  ;;  %vm572_vm2 = vcmask 130112  }
  0x34   :  { %1723 = vmatprep.subr.bf16.mxu0 %v1813_v1  ;;  %1744 = vmatpush3.bf16.msra.mxu1 %v1814_v2  ;;  %v1817_v5 = vld [vmem:[#allocation2] sm:$0xff]   ;;  %v2063_v7 = vld [vmem:[#allocation2 + $0x8] sm:$0xff]   ;;  %v2065_v8 = vld [vmem:[#allocation2 + $0x10] sm:$0xff]   ;;  %v1997_v14 = vmov 1966171168   ;;  %v2098_v18 = vshrl.u32 %v357_v16, 7 }
  0x35   :  { %1724 = vmatpush3.bf16.msra.mxu0 %v1813_v1  ;;  %1745 = vmatprep.subr.bf16.mxu1 %v1995_v0  ;;  %v1820_v9 = vld [vmem:[#allocation2 + $0x18] sm:$0xff]   ;;  %v2078_v10 = vld [vmem:[#allocation2 + $0x20] sm:$0xff]   ;;  %v2083_v11 = vld [vmem:[#allocation2 + $0x28] sm:$0xff]   ;;  %v355_v15 = vunpack.c.l.s4 %v1997_v14  ;;  %vm637_vm3 = vcmask 1041409   ;;  %vm639_vm4 = vcmask 1042434   ;;  %vm641_vm5 = vcmask 1043459  }
  0x36   :  { %1725 = vmatprep.subr.bf16.mxu0 %v1815_v3  ;;  %1727 = vmatprep.mubr.msk.bf16.mxu0 %vm164_vm1, %v1817_v5  ;;  %v2085_v12 = vld [vmem:[#allocation2 + $0x30] sm:$0xff]   ;;  %v2091_v13 = vld [vmem:[#allocation2 + $0x38] sm:$0xff]   ;;  %v1681_v19 = vld [vmem:[%s2530_s5] ss:$0 sm:$0xff]  ;;  %v2105_v28 = vsub.s32 0, %v2098_v18  ;;  %vm643_vm6 = vcmask 1044484  }
  0x37   :  { %v356_v17 = vunpack.c.0.s8 %v355_v15  ;;  %v2110_v29 = vld [vmem:[%s2528_s3] ss:$0 sm:$0xff]  ;;  %vm645_vm7 = vcmask 1045509   ;;  %vm647_vm8 = vcmask 1046534   ;;  %vm649_vm9 = vcmask 1047559  }
  0x38   :  { %1746 = vmatpush3.bf16.msra.mxu1 %v1816_v4  ;;  %v2122_v52 = vld [vmem:[%s2531_s6] ss:$0 sm:$0xff]  ;;  %vm652_vm10 = vcmask 130048   ;;  %s1999_s6 = smov [#allocation11]  }
  0x39   :  { %1726 = vmatpush3.bf16.msra.mxu0 %v1815_v3  ;;  %1751 = vmatprep.subr.bf16.mxu1 %v1995_v0  ;;  %v359_v20 = vsub.s32 %v356_v17, %v2098_v18  ;;  %s1647_s27 = sshll.u32 %s1999_s6, 4  ;;  %s1648_s27 = int_to_ptr.vmem [resolvable:$true] %s1647_s27 }
  0x3a   :  { %1769 = vmatprep.subr.bf16.mxu0 %v1995_v0  ;;  %s1939_s28 = scalar_lea.vmem %s1648_s27, 128  ;;  %p1944_p7 = scmp.lt.s32.totalorder %s1648_s27, %s1648_s27 }
  0x3b   :  { %1748 = vmatmul.mubr.msk.bf16.vlgmr.msra.gmra.mxu1 %vm164_vm1, %v100_v6  ;;  %p1940_p6 = scmp.ne.s32.totalorder %s1648_s27, %s1939_s28  ;;  %p1945_p8 = scmp.lt.s32.totalorder %s1939_s28, %s1939_s28 }
  0x3c   :  { %1728 = vmatmul.mubr.msk.bf16.vlgmr.msra.gmra.mxu0 %vm164_vm1, %v2063_v7  ;;  %1752 = vmatpush3.bf16.msra.mxu1 %v1817_v5 }
  0x3d   :  { %1731 = vmatprep.mubr.msk.bf16.mxu0 %vm164_vm1, %v2065_v8  ;;  %1753 = vmatprep.mubr.msk.bf16.mxu1 %vm1996_vm0, %v1995_v0  ;;  %p1946_p9 = por %p1945_p8, %p1944_p7 }
  0x3e   :  { %1770 = vmatpush3.bf16.msra.mxu0 %v1820_v9  ;;  %1757 = vmatprep.subr.bf16.mxu1 %v1995_v0 }
  0x3f   :  { %1781 = vmatprep.subr.bf16.mxu0 %v1995_v0  ;;  %p1947_p10 = pnand %p1946_p9, %p1940_p6 }
  0x44   :  { %1732 = vmatmul.mubr.msk.bf16.gmra.mxu0 %vm164_vm1, %v1820_v9 }
  0x45   :  { %1735 = vmatprep.mubr.msk.bf16.mxu0 %vm164_vm1, %v2078_v10 }
  0x4c   :  { %1736 = vmatmul.mubr.msk.bf16.gmra.mxu0 %vm164_vm1, %v2083_v11 }
  0x4d   :  { %1739 = vmatprep.mubr.msk.bf16.mxu0 %vm164_vm1, %v2085_v12 }
  0x54   :  { %1740 = vmatmul.mubr.msk.bf16.gmra.mxu0 %vm164_vm1, %v2091_v13 }
  0x55   :  { %1771 = vmatprep.mubr.msk.bf16.mxu0 %vm1996_vm0, %v1995_v0 }
  0xfb   :  { %v346_v21 = vpop.f32.mrf.mxu1 }
  0xfc   :  { %v1729_v22 = vpop.f32.mrf.mxu0  ;;  %v347_v23 = vadd.f32 %v1681_v19, %v346_v21 }
  0xfd   :  { %v1749_v24 = vpop.f32.mrf.mxu1  ;;  %v232_v42 = vadd.f32 %v1729_v22, %v2110_v29 }
  0xfe   :  { %v223_v25 = vpop.f32.mrf.mxu0  ;;  %v353_v26 = vcombine.high %v347_v23, %v347_v23  ;;  %v360_v27 = vrot.slane %v347_v23, %v359_v20 }
  0xff   :  { %v349_v30 = vpop.f32.mrf.mxu1  ;;  %v224_v38 = vadd.f32 %v2110_v29, %v223_v25 }
 0x100   :  { %v1730_v31 = vpop.f32.mrf.mxu0  ;;  %v367_v32 = vrot.slane %v353_v26, %v359_v20  ;;  %v368_v33 = vcombine.high %v360_v27, %v360_v27  ;;  %v376_v34 = vrot.slane %v360_v27, %v359_v20 }
 0x101   :  { %v1750_v35 = vpop.f32.mrf.mxu1  ;;  %v235_v47 = vadd.f32 %v1730_v31, %v2110_v29 }
 0x102   :  { %v226_v36 = vpop.f32.mrf.mxu0  ;;  %v390_v37 = vrot.slane %v368_v33, %v359_v20  ;;  %v405_v39 = vrot.slane %v376_v34, %v2105_v28  ;;  %v369_v41 = vcombine.high %v367_v32, %v367_v32  ;;  %v398_v44 = vcombine.high %v376_v34, %v376_v34 }
 0x103   :  { %v227_v40 = vadd.f32 %v2110_v29, %v226_v36  ;;  %v383_v23 = vrot.slane %v367_v32, %v359_v20 }
 0x104   :  { %v1733_v43 = vpop.f32.mrf.mxu0  ;;  %v409_v45 = vrot.slane %v390_v37, %v2105_v28  ;;  %v442_v46 = vadd.f32 %v405_v39, %v224_v38  ;;  %v400_v50 = vcombine.high %v390_v37, %v390_v37  ;;  %v413_v59 = vrot.slane %v398_v44, %v2105_v28 }
 0x105   :  { %v443_v48 = vadd.f32 %v405_v39, %v227_v40  ;;  %v248_v49 = vadd.f32 %v1733_v43, %v2110_v29  ;;  %v397_v61 = vrot.slane %v369_v41, %v359_v20  ;;  %v421_v32 = vrot.slane %v383_v23, %v2105_v28 }
 0x106   :  { %v239_v51 = vpop.f32.mrf.mxu0  ;;  %v444_v53 = vadd.f32 %v409_v45, %v232_v42  ;;  %v458_v54 = vmax.f32 %v442_v46, 0.0  ;;  %v445_v55 = vadd.f32 %v409_v45, %v235_v47  ;;  %v417_v57 = vrot.slane %v400_v50, %v2105_v28 }
 0x107   :  { %v459_v56 = vmax.f32 %v443_v48, 0.0  ;;  %v240_v58 = vadd.f32 %v2110_v29, %v239_v51  ;;  %v425_v22 = vrot.slane %v397_v61, %v2105_v28  ;;  %v399_v44 = vcombine.high %v383_v23, %v383_v23 }
 0x108   :  { %v1734_v60 = vpop.f32.mrf.mxu0  ;;  %v460_v62 = vmax.f32 %v444_v53, 0.0  ;;  %v461_v63 = vmax.f32 %v445_v55, 0.0  ;;  %v481_v2 = vmul.f32 %v2122_v52, %v458_v54  ;;  %v448_v3 = vadd.f32 %v417_v57, %v248_v49 }
 0x109   :  { %v251_v1 = vadd.f32 %v1734_v60, %v2110_v29  ;;  %v446_v4 = vadd.f32 %v413_v59, %v240_v58  ;;  %v482_v6 = vmul.f32 %v2122_v52, %v459_v56  ;;  %v401_v51 = vcombine.high %v397_v61, %v397_v61 }
 0x10a   :  { %v242_v5 = vpop.f32.mrf.mxu0  ;;  %v497_v15 = vsel %vm164_vm1, %v481_v2, 0.0  ;;  %v483_v17 = vmul.f32 %v2122_v52, %v460_v62  ;;  %v464_v19 = vmax.f32 %v448_v3, 0.0  ;;  %v484_v24 = vmul.f32 %v2122_v52, %v461_v63 }
 0x10b   :  { %v449_v9 = vadd.f32 %v417_v57, %v251_v1  ;;  %v243_v14 = vadd.f32 %v2110_v29, %v242_v5  ;;  %498 = vadd.xlane.f32.xlu0 %v497_v15  ;;  %v462_v31 = vmax.f32 %v446_v4, 0.0  ;;  %v500_v36 = vsel %vm164_vm1, %v482_v6, 0.0 }
 0x10c   :  { %v1737_v21 = vpop.f32.mrf.mxu0  ;;  %v503_v30 = vsel %vm164_vm1, %v483_v17, 0.0  ;;  %v487_v37 = vmul.f32 %v2122_v52, %v464_v19  ;;  %v506_v40 = vsel %vm164_vm1, %v484_v24, 0.0  ;;  %v429_v58 = vrot.slane %v399_v44, %v2105_v28 }
 0x10d   :  { %v465_v25 = vmax.f32 %v449_v9, 0.0  ;;  %v447_v26 = vadd.f32 %v413_v59, %v243_v14  ;;  %v264_v27 = vadd.f32 %v1737_v21, %v2110_v29  ;;  %504 = vadd.xlane.f32.xlu1 %v503_v30  ;;  %v485_v45 = vmul.f32 %v2122_v52, %v462_v31 }
 0x10e   :  { %v255_v33 = vpop.f32.mrf.mxu0  ;;  %v515_v49 = vsel %vm164_vm1, %v487_v37, 0.0  ;;  %v433_v61 = vrot.slane %v401_v51, %v2105_v28 }
 0x10f   :  { %v452_v34 = vadd.f32 %v425_v22, %v264_v27  ;;  %v256_v35 = vadd.f32 %v2110_v29, %v255_v33  ;;  %v463_v38 = vmax.f32 %v447_v26, 0.0  ;;  %501 = vadd.xlane.f32.xlu0 %v500_v36  ;;  %v488_v41 = vmul.f32 %v2122_v52, %v465_v25 }
 0x110   :  { %v1738_v20 = vpop.f32.mrf.mxu0  ;;  %v509_v1 = vsel %vm164_vm1, %v485_v45, 0.0  ;;  %v562_v45 = vand.u32 127, %v357_v16 }
 0x111   :  { %v267_v39 = vadd.f32 %v1738_v20, %v2110_v29  ;;  %v468_v42 = vmax.f32 %v452_v34, 0.0  ;;  %507 = vadd.xlane.f32.xlu1 %v506_v40  ;;  %v450_v46 = vadd.f32 %v421_v32, %v256_v35  ;;  %v486_v53 = vmul.f32 %v2122_v52, %v463_v38 }
 0x112   :  { %v258_v43 = vpop.f32.mrf.mxu0  ;;  %v518_v56 = vsel %vm164_vm1, %v488_v41, 0.0  ;;  %v2196_v51 = vsub.s32 %v562_v45, %v2098_v18 }
 0x113   :  { %v453_v47 = vadd.f32 %v425_v22, %v267_v39  ;;  %v259_v48 = vadd.f32 %v2110_v29, %v258_v43  ;;  %516 = vadd.xlane.f32.xlu0 %v515_v49  ;;  %v491_v59 = vmul.f32 %v2122_v52, %v468_v42  ;;  %v466_v60 = vmax.f32 %v450_v46, 0.0 }
 0x114   :  { %v1741_v50 = vpop.f32.mrf.mxu0  ;;  %v512_v3 = vsel %vm164_vm1, %v486_v53, 0.0  ;;  %v567_v46 = vadd.s32 4294967288, %v562_v45 }
 0x115   :  { %v469_v54 = vmax.f32 %v453_v47, 0.0  ;;  %v451_v55 = vadd.f32 %v421_v32, %v259_v48  ;;  %519 = vadd.xlane.f32.xlu1 %v518_v56  ;;  %v280_v62 = vadd.f32 %v1741_v50, %v2110_v29  ;;  %v527_v15 = vsel %vm164_vm1, %v491_v59, 0.0 }
 0x116   :  { %v271_v57 = vpop.f32.mrf.mxu0  ;;  %v489_v22 = vmul.f32 %v2122_v52, %v466_v60  ;;  %v2191_v49 = vsub.s32 %v567_v46, %v2098_v18 }
 0x117   :  { %v272_v63 = vadd.f32 %v2110_v29, %v271_v57  ;;  %510 = vadd.xlane.f32.xlu0 %v509_v1  ;;  %v467_v4 = vmax.f32 %v451_v55, 0.0  ;;  %v492_v9 = vmul.f32 %v2122_v52, %v469_v54  ;;  %v456_v17 = vadd.f32 %v433_v61, %v280_v62 }
 0x118   :  { %v1742_v2 = vpop.f32.mrf.mxu0  ;;  %v521_v31 = vsel %vm164_vm1, %v489_v22, 0.0 }
 0x119   :  { %v454_v5 = vadd.f32 %v429_v58, %v272_v63  ;;  %v283_v6 = vadd.f32 %v1742_v2, %v2110_v29  ;;  %513 = vadd.xlane.f32.xlu1 %v512_v3  ;;  %v530_v25 = vsel %vm164_vm1, %v492_v9, 0.0  ;;  %v490_v26 = vmul.f32 %v2122_v52, %v467_v4 }
 0x11a   :  { %v274_v14 = vpop.f32.mrf.mxu0  ;;  %v472_v27 = vmax.f32 %v456_v17, 0.0 }
 0x11b   :  { %v470_v19 = vmax.f32 %v454_v5, 0.0  ;;  %v275_v21 = vadd.f32 %v2110_v29, %v274_v14  ;;  %528 = vadd.xlane.f32.xlu0 %v527_v15  ;;  %v457_v23 = vadd.f32 %v433_v61, %v283_v6  ;;  %v524_v29 = vsel %vm164_vm1, %v490_v26, 0.0 }
 0x11c   :  { %v495_v38 = vmul.f32 %v2122_v52, %v472_v27 }
 0x11d   :  { %v455_v24 = vadd.f32 %v429_v58, %v275_v21  ;;  %531 = vadd.xlane.f32.xlu1 %v530_v25  ;;  %v493_v33 = vmul.f32 %v2122_v52, %v470_v19  ;;  %v473_v34 = vmax.f32 %v457_v23, 0.0 }
 0x11e   :  { %v539_v32 = vsel %vm164_vm1, %v495_v38, 0.0 }
 0x11f   :  { %v471_v30 = vmax.f32 %v455_v24, 0.0  ;;  %522 = vadd.xlane.f32.xlu0 %v521_v31  ;;  %v533_v36 = vsel %vm164_vm1, %v493_v33, 0.0  ;;  %v496_v20 = vmul.f32 %v2122_v52, %v473_v34 }
 0x121   :  { %v494_v35 = vmul.f32 %v2122_v52, %v471_v30  ;;  %525 = vadd.xlane.f32.xlu1 %v524_v29  ;;  %v542_v39 = vsel %vm164_vm1, %v496_v20, 0.0  ;;  %v1998_v20 = vmov 0  }
 0x122   :  { %1812 = vset.pattern.permute.xlu0 %v1998_v20  ;;  %1811 = vset.pattern.permute.xlu1 %v1998_v20 }
 0x123   :  { %v536_v37 = vsel %vm164_vm1, %v494_v35, 0.0  ;;  %534 = vadd.xlane.f32.xlu0 %v533_v36 }
 0x125   :  { %537 = vadd.xlane.f32.xlu1 %v536_v37 }
 0x127   :  { %540 = vadd.xlane.f32.xlu0 %v539_v32  ;;  %v663_v32 = vsub.s32 1, %v2098_v18 }
 0x129   :  { %543 = vadd.xlane.f32.xlu1 %v542_v39 }
 0x194   :  { %v2173_v40 = vpop.xlane.xlu0 %498 }
 0x195   :  { %v566_v59 = vrot.slane %v2173_v40, %v2196_v51 }
 0x196   :  { %v2175_v41 = vpop.xlane.xlu1 %504 }
 0x197   :  { %v577_v55 = vrot.slane %v2175_v41, %v2196_v51 }
 0x198   :  { %v2177_v42 = vpop.xlane.xlu0 %501 }
 0x199   :  { %v571_v56 = vrot.slane %v2177_v42, %v2191_v49 }
 0x19a   :  { %v2179_v43 = vpop.xlane.xlu1 %507 }
 0x19b   :  { %v581_v53 = vrot.slane %v2179_v43, %v2191_v49  ;;  %v573_v1 = vsel %vm572_vm2, %v571_v56, %v566_v59  ;;  %v667_v56 = vsub.s32 2, %v2098_v18  ;;  %v683_v59 = vsub.s32 6, %v2098_v18 }
 0x19c   :  { %v2181_v44 = vpop.xlane.xlu0 %516 }
 0x19d   :  { %v582_v60 = vsel %vm572_vm2, %v581_v53, %v577_v55  ;;  %v595_v6 = vrot.slane %v2181_v44, %v2196_v51  ;;  %v679_v53 = vsub.s32 5, %v2098_v18 }
 0x19e   :  { %v2184_v52 = vpop.xlane.xlu1 %519  ;;  %v638_v3 = vsel %vm637_vm3, %v582_v60, %v573_v1 }
 0x19f   :  { %v599_v61 = vrot.slane %v2184_v52, %v2191_v49 }
 0x1a0   :  { %v2186_v47 = vpop.xlane.xlu0 %510 }
 0x1a1   :  { %v586_v57 = vrot.slane %v2186_v47, %v2196_v51  ;;  %v600_v17 = vsel %vm572_vm2, %v599_v61, %v595_v6 }
 0x1a2   :  { %v2188_v48 = vpop.xlane.xlu1 %513 }
 0x1a3   :  { %v590_v16 = vrot.slane %v2188_v48, %v2191_v49 }
 0x1a4   :  { %v2193_v50 = vpop.xlane.xlu0 %528 }
 0x1a5   :  { %v591_v62 = vsel %vm572_vm2, %v590_v16, %v586_v57  ;;  %v613_v25 = vrot.slane %v2193_v50, %v2196_v51 }
 0x1a6   :  { %v2202_v54 = vpop.xlane.xlu1 %531  ;;  %v640_v9 = vsel %vm639_vm4, %v591_v62, %v638_v3 }
 0x1a7   :  { %v617_v19 = vrot.slane %v2202_v54, %v2191_v49  ;;  %v642_v24 = vsel %vm641_vm5, %v600_v17, %v640_v9 }
 0x1a8   :  { %v2210_v58 = vpop.xlane.xlu0 %522 }
 0x1a9   :  { %v604_v4 = vrot.slane %v2210_v58, %v2196_v51  ;;  %v618_v31 = vsel %vm572_vm2, %v617_v19, %v613_v25 }
 0x1aa   :  { %v2216_v63 = vpop.xlane.xlu1 %525 }
 0x1ab   :  { %v608_v2 = vrot.slane %v2216_v63, %v2191_v49 }
 0x1ac   :  { %v2226_v5 = vpop.xlane.xlu0 %534 }
 0x1ad   :  { %v609_v14 = vsel %vm572_vm2, %v608_v2, %v604_v4  ;;  %v622_v22 = vrot.slane %v2226_v5, %v2196_v51  ;;  %v671_v4 = vsub.s32 3, %v2098_v18 }
 0x1ae   :  { %v2232_v15 = vpop.xlane.xlu1 %537  ;;  %v644_v26 = vsel %vm643_vm6, %v609_v14, %v642_v24 }
 0x1af   :  { %v626_v21 = vrot.slane %v2232_v15, %v2191_v49  ;;  %v646_v29 = vsel %vm645_vm7, %v618_v31, %v644_v26 }
 0x1b0   :  { %v2241_v23 = vpop.xlane.xlu0 %540 }
 0x1b1   :  { %v627_v30 = vsel %vm572_vm2, %v626_v21, %v622_v22  ;;  %v631_v33 = vrot.slane %v2241_v23, %v2196_v51 }
 0x1b2   :  { %v2247_v27 = vpop.xlane.xlu1 %543  ;;  %v648_v36 = vsel %vm647_vm8, %v627_v30, %v646_v29 }
 0x1b3   :  { %v635_v34 = vrot.slane %v2247_v27, %v2191_v49 }
 0x1b5   :  { %v636_v35 = vsel %vm572_vm2, %v635_v34, %v631_v33 }
 0x1b6   :  { %v650_v37 = vsel %vm649_vm9, %v636_v35, %v648_v36 }
 0x1b7   :  { %v653_v38 = vsel %vm652_vm10, %v650_v37, -inf }
 0x1b8   :  { %654 = vmax.xlane.f32.xlu0 %v653_v38 }
 0x241   :  { %v655_v39 = vpop.xlane.xlu0 %654 }
 0x242   :  { %v660_v45 = vrot.slane %v655_v39, %v2105_v28  ;;  %v664_v46 = vrot.slane %v655_v39, %v663_v32  ;;  %v2272_v60 = vrot.slane %v655_v39, %v679_v53  ;;  %v668_v61 = vrot.slane %v655_v39, %v667_v56 }
 0x243   :  { %v672_v19 = vrot.slane %v655_v39, %v671_v4 }
 0x244   :  { %v697_v16 = vsub.f32 %v2173_v40, %v660_v45  ;;  %v698_v55 = vsub.f32 %v2177_v42, %v660_v45  ;;  %v699_v57 = vsub.f32 %v2175_v41, %v664_v46  ;;  %v700_v2 = vsub.f32 %v2179_v43, %v664_v46 }
 0x245   :  { %v687_v42 = vsub.s32 7, %v2098_v18  ;;  %v684_v41 = vrot.slane %v655_v39, %v683_v59  ;;  %v707_v3 = vsub.f32 %v2193_v50, %v2272_v60  ;;  %v701_v6 = vsub.f32 %v2186_v47, %v668_v61 }
 0x246   :  { %v713_v62 = vmul.f32 1.442695, %v697_v16  ;;  %v715_v1 = vmul.f32 1.442695, %v698_v55  ;;  %v717_v40 = vmul.f32 1.442695, %v699_v57  ;;  %v702_v21 = vsub.f32 %v2188_v48, %v668_v61 }
 0x247   :  { %v719_v9 = vmul.f32 1.442695, %v700_v2  ;;  %v688_v43 = vrot.slane %v655_v39, %v687_v42  ;;  %v709_v14 = vsub.f32 %v2226_v5, %v684_v41  ;;  %v733_v17 = vmul.f32 1.442695, %v707_v3 }
 0x248   :  { %1825 = vpow2.f32 %v713_v62  ;;  %v721_v22 = vmul.f32 1.442695, %v701_v6  ;;  %v675_v47 = vsub.s32 4, %v2098_v18  ;;  %v703_v25 = vsub.f32 %v2181_v44, %v672_v19 }
 0x249   :  { %1827 = vpow2.f32 %v715_v1  ;;  %v711_v50 = vsub.f32 %v2241_v23, %v688_v43  ;;  %v737_v24 = vmul.f32 1.442695, %v709_v14  ;;  %v723_v26 = vmul.f32 1.442695, %v702_v21 }
 0x24a   :  { %1829 = vpow2.f32 %v717_v40  ;;  %v676_v48 = vrot.slane %v655_v39, %v675_v47  ;;  %v704_v23 = vsub.f32 %v2184_v52, %v672_v19  ;;  %v725_v33 = vmul.f32 1.442695, %v703_v25 }
 0x24b   :  { %1831 = vpow2.f32 %v719_v9  ;;  %v741_v31 = vmul.f32 1.442695, %v711_v50  ;;  %v710_v46 = vsub.f32 %v2232_v15, %v684_v41 }
 0x24c   :  { %1833 = vpow2.f32 %v733_v17  ;;  %v705_v34 = vsub.f32 %v2210_v58, %v676_v48  ;;  %v727_v29 = vmul.f32 1.442695, %v704_v23  ;;  %v706_v37 = vsub.f32 %v2216_v63, %v676_v48 }
 0x24d   :  { %1835 = vpow2.f32 %v721_v22  ;;  %v708_v58 = vsub.f32 %v2202_v54, %v2272_v60  ;;  %v712_v54 = vsub.f32 %v2247_v27, %v688_v43  ;;  %v739_v57 = vmul.f32 1.442695, %v710_v46 }
 0x24e   :  { %1837 = vpow2.f32 %v737_v24  ;;  %v729_v52 = vmul.f32 1.442695, %v705_v34  ;;  %v731_v39 = vmul.f32 1.442695, %v706_v37 }
 0x24f   :  { %1839 = vpow2.f32 %v723_v26  ;;  %v735_v16 = vmul.f32 1.442695, %v708_v58  ;;  %v743_v62 = vmul.f32 1.442695, %v712_v54 }
 0x250   :  { %1841 = vpow2.f32 %v741_v31 }
 0x251   :  { %1843 = vpow2.f32 %v725_v33 }
 0x252   :  { %1845 = vpow2.f32 %v727_v29 }
 0x253   :  { %1847 = vpow2.f32 %v729_v52 }
 0x254   :  { %1849 = vpow2.f32 %v731_v39 }
 0x255   :  { %v2293_v30 = vpop.eup %1825  ;;  %1851 = vpow2.f32 %v735_v16 }
 0x256   :  { %v2295_v5 = vpop.eup %1827  ;;  %762 = vperm.xlu1 %1811, %v2293_v30   ;;  %1853 = vpow2.f32 %v739_v57 }
 0x257   :  { %765 = vperm.xlu0 %1812, %v2295_v5   ;;  %v2302_v44 = vpop.eup %1829  ;;  %1855 = vpow2.f32 %v743_v62 }
 0x258   :  { %v2306_v35 = vpop.eup %1831 }
 0x259   :  { %v2309_v36 = vpop.eup %1833 }
 0x25a   :  { %768 = vperm.xlu1 %1811, %v2302_v44   ;;  %v2313_v38 = vpop.eup %1835 }
 0x25b   :  { %792 = vperm.xlu0 %1812, %v2309_v36   ;;  %v2316_v20 = vpop.eup %1837 }
 0x25c   :  { %v2321_v45 = vpop.eup %1839 }
 0x25d   :  { %v2324_v63 = vpop.eup %1841 }
 0x25e   :  { %771 = vperm.xlu1 %1811, %v2306_v35   ;;  %v2328_v55 = vpop.eup %1843 }
 0x25f   :  { %798 = vperm.xlu0 %1812, %v2316_v20   ;;  %v2332_v60 = vpop.eup %1845 }
 0x260   :  { %v2335_v1 = vpop.eup %1847 }
 0x261   :  { %v2338_v15 = vpop.eup %1849 }
 0x262   :  { %774 = vperm.xlu1 %1811, %v2313_v38   ;;  %v2341_v61 = vpop.eup %1851 }
 0x263   :  { %804 = vperm.xlu0 %1812, %v2324_v63   ;;  %v2344_v27 = vpop.eup %1853 }
 0x264   :  { %v2347_v2 = vpop.eup %1855 }
 0x266   :  { %777 = vperm.xlu1 %1811, %v2321_v45  }
 0x26a   :  { %780 = vperm.xlu1 %1811, %v2328_v55  }
 0x26e   :  { %783 = vperm.xlu1 %1811, %v2332_v60  }
 0x272   :  { %786 = vperm.xlu1 %1811, %v2335_v1  }
 0x276   :  { %789 = vperm.xlu1 %1811, %v2338_v15  }
 0x27a   :  { %795 = vperm.xlu1 %1811, %v2341_v61  }
 0x27e   :  { %801 = vperm.xlu1 %1811, %v2344_v27  }
 0x282   :  { %807 = vperm.xlu1 %1811, %v2347_v2  }
 0x2d1   :  { %v763_v40 = vpop.permute.xlu1 %762 }
 0x2d2   :  { %v766_v14 = vpop.permute.xlu0 %765  ;;  %v812_v48 = vrot.slane %v763_v40, %v2196_v51 }
 0x2d3   :  { %v816_v31 = vrot.slane %v766_v14, %v2191_v49 }
 0x2d5   :  { %v769_v41 = vpop.permute.xlu1 %768  ;;  %v817_v54 = vsel %vm572_vm2, %v816_v31, %v812_v48 }
 0x2d6   :  { %v793_v21 = vpop.permute.xlu0 %792  ;;  %v821_v23 = vrot.slane %v769_v41, %v2196_v51 }
 0x2d7   :  { %v857_v57 = vrot.slane %v793_v21, %v2196_v51 }
 0x2d9   :  { %v772_v3 = vpop.permute.xlu1 %771 }
 0x2da   :  { %v825_v50 = vrot.slane %v772_v3, %v2191_v49  ;;  %v799_v24 = vpop.permute.xlu0 %798 }
 0x2db   :  { %v866_v41 = vrot.slane %v799_v24, %v2196_v51 }
 0x2dc   :  { %v826_v37 = vsel %vm572_vm2, %v825_v50, %v821_v23 }
 0x2dd   :  { %v775_v6 = vpop.permute.xlu1 %774  ;;  %v881_v3 = vsel %vm637_vm3, %v826_v37, %v817_v54 }
 0x2de   :  { %v830_v34 = vrot.slane %v775_v6, %v2196_v51  ;;  %v805_v6 = vpop.permute.xlu0 %804 }
 0x2e1   :  { %v778_v9 = vpop.permute.xlu1 %777 }
 0x2e2   :  { %v834_v25 = vrot.slane %v778_v9, %v2191_v49 }
 0x2e4   :  { %v835_v39 = vsel %vm572_vm2, %v834_v25, %v830_v34 }
 0x2e5   :  { %v781_v43 = vpop.permute.xlu1 %780 }
 0x2e6   :  { %v839_v52 = vrot.slane %v781_v43, %v2196_v51  ;;  %v882_v43 = vsel %vm639_vm4, %v835_v39, %v881_v3 }
 0x2e9   :  { %v784_v17 = vpop.permute.xlu1 %783 }
 0x2ea   :  { %v843_v33 = vrot.slane %v784_v17, %v2191_v49 }
 0x2ec   :  { %v844_v62 = vsel %vm572_vm2, %v843_v33, %v839_v52 }
 0x2ed   :  { %v787_v19 = vpop.permute.xlu1 %786  ;;  %v883_v17 = vsel %vm641_vm5, %v844_v62, %v882_v43 }
 0x2ee   :  { %v848_v46 = vrot.slane %v787_v19, %v2196_v51 }
 0x2f1   :  { %v790_v22 = vpop.permute.xlu1 %789 }
 0x2f2   :  { %v852_v29 = vrot.slane %v790_v22, %v2191_v49  ;;  %v875_v22 = vrot.slane %v805_v6, %v2196_v51 }
 0x2f4   :  { %v853_v9 = vsel %vm572_vm2, %v852_v29, %v848_v46 }
 0x2f5   :  { %v796_v26 = vpop.permute.xlu1 %795  ;;  %v884_v50 = vsel %vm643_vm6, %v853_v9, %v883_v17 }
 0x2f6   :  { %v861_v58 = vrot.slane %v796_v26, %v2191_v49 }
 0x2f8   :  { %v862_v14 = vsel %vm572_vm2, %v861_v58, %v857_v57 }
 0x2f9   :  { %v802_v16 = vpop.permute.xlu1 %801  ;;  %v885_v25 = vsel %vm645_vm7, %v862_v14, %v884_v50 }
 0x2fa   :  { %v870_v40 = vrot.slane %v802_v16, %v2191_v49 }
 0x2fc   :  { %v871_v19 = vsel %vm572_vm2, %v870_v40, %v866_v41 }
 0x2fd   :  { %v808_v21 = vpop.permute.xlu1 %807  ;;  %v886_v31 = vsel %vm647_vm8, %v871_v19, %v885_v25 }
 0x2fe   :  { %v879_v24 = vrot.slane %v808_v21, %v2191_v49 }
 0x300   :  { %v880_v26 = vsel %vm572_vm2, %v879_v24, %v875_v22 }
 0x301   :  { %v887_v48 = vsel %vm649_vm9, %v880_v26, %v886_v31 }
 0x302   :  { %v889_v23 = vsel %vm652_vm10, %v887_v48, 0.0 }
 0x303   :  { %890 = vadd.xlane.f32.xlu0 %v889_v23 }
 0x38c   :  { %v891_v33 = vpop.xlane.xlu0 %890 }
 0x38d   :  { %1857 = vrcp.f32 %v891_v33 }
 0x39a   :  { %v1858_v34 = vpop.eup %1857 }
 0x39b   :  { %v913_v29 = vrot.slane %v1858_v34, %v675_v47  ;;  %v897_v37 = vrot.slane %v1858_v34, %v2105_v28  ;;  %v925_v52 = vrot.slane %v1858_v34, %v687_v42  ;;  %v901_v58 = vrot.slane %v1858_v34, %v663_v32 }
 0x39c   :  { %v917_v19 = vrot.slane %v1858_v34, %v679_v53 }
 0x39d   :  { %v942_v39 = vmul.f32 %v2335_v1, %v913_v29  ;;  %v2391_v46 = vmul.f32 %v2338_v15, %v913_v29  ;;  %v934_v16 = vmul.f32 %v2293_v30, %v897_v37  ;;  %v2395_v54 = vmul.f32 %v2295_v5, %v897_v37 }
 0x39e   :  { %v948_v47 = vmul.f32 %v2324_v63, %v925_v52  ;;  %v2399_v28 = vmul.f32 %v2347_v2, %v925_v52  ;;  %v936_v32 = vmul.f32 %v2302_v44, %v901_v58  ;;  %v937_v30 = vmul.f32 %v2306_v35, %v901_v58 }
 0x39f   :  { %v1099_v42 = vpack.c.bf16 %v2391_v46, %v942_v39  ;;  %v1095_v57 = vpack.c.bf16 %v2395_v54, %v934_v16  ;;  %v905_v2 = vrot.slane %v1858_v34, %v667_v56  ;;  %v909_v35 = vrot.slane %v1858_v34, %v671_v4 }
 0x3a0   :  { %v1102_v15 = vpack.c.bf16 %v2399_v28, %v948_v47  ;;  %v1096_v63 = vpack.c.bf16 %v937_v30, %v936_v32  ;;  %v944_v4 = vmul.f32 %v2309_v36, %v917_v19 }
 0x3a1   :  { %v1356_v1 = vunpack.c.l.b16 %v1099_v42  ;;  %v1104_v62 = vunpack.c.l.b16 %v1095_v57  ;;  %v1105_v40 = vunpack.c.h.b16 %v1095_v57  ;;  %v938_v3 = vmul.f32 %v2313_v38, %v905_v2 }
 0x3a2   :  { %v1545_v5 = vunpack.c.l.b16 %v1102_v15  ;;  %v1167_v41 = vunpack.c.l.b16 %v1096_v63  ;;  %v939_v44 = vmul.f32 %v2321_v45, %v905_v2  ;;  %v1168_v6 = vunpack.c.h.b16 %v1096_v63 }
 0x3a3   :  { %1359 = vperm.xlu0 %1812, %v1356_v1   ;;  %1107 = vperm.xlu1 %1811, %v1104_v62   ;;  %v940_v14 = vmul.f32 %v2328_v55, %v909_v35  ;;  %v941_v56 = vmul.f32 %v2332_v60, %v909_v35  ;;  %v921_v55 = vrot.slane %v1858_v34, %v683_v59  ;;  %v1357_v50 = vunpack.c.h.b16 %v1099_v42 }
 0x3a4   :  { %v1097_v9 = vpack.c.bf16 %v939_v44, %v938_v3  ;;  %v945_v60 = vmul.f32 %v2341_v61, %v917_v19  ;;  %v1546_v61 = vunpack.c.h.b16 %v1102_v15 }
 0x3a5   :  { %v1098_v38 = vpack.c.bf16 %v941_v56, %v940_v14  ;;  %v946_v22 = vmul.f32 %v2316_v20, %v921_v55  ;;  %v947_v53 = vmul.f32 %v2344_v27, %v921_v55 }
 0x3a6   :  { %v1230_v43 = vunpack.c.l.b16 %v1097_v9  ;;  %v1231_v17 = vunpack.c.h.b16 %v1097_v9  ;;  %v1100_v24 = vpack.c.bf16 %v945_v60, %v944_v4 }
 0x3a7   :  { %1548 = vperm.xlu0 %1812, %v1545_v5   ;;  %1110 = vperm.xlu1 %1811, %v1105_v40   ;;  %v1293_v45 = vunpack.c.l.b16 %v1098_v38  ;;  %v1294_v21 = vunpack.c.h.b16 %v1098_v38  ;;  %v1101_v26 = vpack.c.bf16 %v947_v53, %v946_v22 }
 0x3a8   :  { %v1419_v25 = vunpack.c.l.b16 %v1100_v24  ;;  %v1420_v36 = vunpack.c.h.b16 %v1100_v24 }
 0x3a9   :  { %v1482_v18 = vunpack.c.l.b16 %v1101_v26  ;;  %v1483_v59 = vunpack.c.h.b16 %v1101_v26 }
 0x3ab   :  { %967 = vperm.xlu0 %1812, %v934_v16   ;;  %1170 = vperm.xlu1 %1811, %v1167_v41  }
 0x3af   :  { %973 = vperm.xlu0 %1812, %v936_v32   ;;  %1173 = vperm.xlu1 %1811, %v1168_v6  }
 0x3b3   :  { %979 = vperm.xlu0 %1812, %v938_v3   ;;  %1233 = vperm.xlu1 %1811, %v1230_v43  }
 0x3b7   :  { %985 = vperm.xlu0 %1812, %v940_v14   ;;  %1236 = vperm.xlu1 %1811, %v1231_v17  }
 0x3bb   :  { %991 = vperm.xlu0 %1812, %v942_v39   ;;  %1296 = vperm.xlu1 %1811, %v1293_v45  }
 0x3bf   :  { %997 = vperm.xlu0 %1812, %v944_v4   ;;  %1299 = vperm.xlu1 %1811, %v1294_v21  }
 0x3c3   :  { %1003 = vperm.xlu0 %1812, %v946_v22   ;;  %1362 = vperm.xlu1 %1811, %v1357_v50  }
 0x3c7   :  { %1009 = vperm.xlu0 %1812, %v948_v47   ;;  %1422 = vperm.xlu1 %1811, %v1419_v25  }
 0x3cb   :  { %1425 = vperm.xlu1 %1811, %v1420_v36  }
 0x3cf   :  { %1485 = vperm.xlu1 %1811, %v1482_v18  }
 0x3d3   :  { %1488 = vperm.xlu1 %1811, %v1483_v59  }
 0x3d7   :  { %1551 = vperm.xlu1 %1811, %v1546_v61  }
 0x3db   :  { %970 = vperm.xlu1 %1811, %v2395_v54  }
 0x3df   :  { %976 = vperm.xlu1 %1811, %v937_v30  }
 0x3e3   :  { %982 = vperm.xlu1 %1811, %v939_v44  }
 0x3e7   :  { %988 = vperm.xlu1 %1811, %v941_v56  }
 0x3eb   :  { %994 = vperm.xlu1 %1811, %v2391_v46  }
 0x3ef   :  { %1000 = vperm.xlu1 %1811, %v945_v60  }
 0x3f3   :  { %1006 = vperm.xlu1 %1811, %v947_v53  }
 0x3f7   :  { %1012 = vperm.xlu1 %1811, %v2399_v28  }
 0x41e   :  { %v1108_v20 = vpop.permute.xlu1 %1107 }
 0x41f   :  { %v1115_v31 = vrot.slane %v1108_v20, %v2196_v51 }
 0x422   :  { %v1111_v27 = vpop.permute.xlu1 %1110 }
 0x423   :  { %v1119_v48 = vrot.slane %v1111_v27, %v2191_v49 }
 0x425   :  { %v1120_v23 = vsel %vm572_vm2, %v1119_v48, %v1115_v31 }
 0x426   :  { %v1121_v33 = vpack.c.b16 %v1120_v23, %v1120_v23  ;;  %v1171_v34 = vpop.permute.xlu1 %1170 }
 0x427   :  { %v1178_v37 = vrot.slane %v1171_v34, %v2196_v51 }
 0x428   :  { %1754 = vmatmul.mubr.msk.bf16.vlgmr.msra.gmra.mxu1 %vm652_vm10, %v1121_v33 }
 0x429   :  { %1758 = vmatpush3.bf16.msra.mxu1 %v2063_v7  ;;  %1759 = vmatprep.mubr.msk.bf16.mxu1 %vm1996_vm0, %v1995_v0 }
 0x42a   :  { %v1174_v29 = vpop.permute.xlu1 %1173  ;;  %1763 = vmatprep.subr.bf16.mxu1 %v1995_v0 }
 0x42b   :  { %v1182_v52 = vrot.slane %v1174_v29, %v2191_v49 }
 0x42d   :  { %v1183_v58 = vsel %vm572_vm2, %v1182_v52, %v1178_v37 }
 0x42e   :  { %v1184_v39 = vpack.c.b16 %v1183_v58, %v1183_v58  ;;  %v1234_v46 = vpop.permute.xlu1 %1233 }
 0x42f   :  { %v1241_v16 = vrot.slane %v1234_v46, %v2196_v51 }
 0x430   :  { %1760 = vmatmul.mubr.msk.bf16.vlgmr.msra.gmra.mxu1 %vm652_vm10, %v1184_v39 }
 0x431   :  { %1764 = vmatpush3.bf16.msra.mxu1 %v2065_v8  ;;  %1765 = vmatprep.mubr.msk.bf16.mxu1 %vm1996_vm0, %v1995_v0  ;;  %v1360_v8 = vpop.permute.xlu0 %1359 }
 0x432   :  { %v1237_v7 = vpop.permute.xlu1 %1236  ;;  %1775 = vmatprep.subr.bf16.mxu1 %v1995_v0  ;;  %v1367_v5 = vrot.slane %v1360_v8, %v2196_v51 }
 0x433   :  { %v1245_v54 = vrot.slane %v1237_v7, %v2191_v49 }
 0x435   :  { %v1246_v47 = vsel %vm572_vm2, %v1245_v54, %v1241_v16 }
 0x436   :  { %v1247_v28 = vpack.c.b16 %v1246_v47, %v1246_v47  ;;  %v1297_v42 = vpop.permute.xlu1 %1296 }
 0x437   :  { %v1304_v32 = vrot.slane %v1297_v42, %v2196_v51 }
 0x438   :  { %1766 = vmatmul.mubr.msk.bf16.vlgmr.msra.gmra.mxu1 %vm652_vm10, %v1247_v28 }
 0x439   :  { %1776 = vmatpush3.bf16.msra.mxu1 %v2078_v10  ;;  %1777 = vmatprep.mubr.msk.bf16.mxu1 %vm1996_vm0, %v1995_v0  ;;  %v1549_v10 = vpop.permute.xlu0 %1548 }
 0x43a   :  { %v1300_v57 = vpop.permute.xlu1 %1299  ;;  %1787 = vmatprep.subr.bf16.mxu1 %v1995_v0  ;;  %v1556_v21 = vrot.slane %v1549_v10, %v2196_v51 }
 0x43b   :  { %v1308_v1 = vrot.slane %v1300_v57, %v2191_v49 }
 0x43d   :  { %v1309_v62 = vsel %vm572_vm2, %v1308_v1, %v1304_v32  ;;  %v968_v3 = vpop.permute.xlu0 %967 }
 0x43e   :  { %v1310_v15 = vpack.c.b16 %v1309_v62, %v1309_v62  ;;  %v1363_v30 = vpop.permute.xlu1 %1362  ;;  %v1017_v34 = vrot.slane %v968_v3, %v2196_v51 }
 0x43f   :  { %v1371_v40 = vrot.slane %v1363_v30, %v2191_v49 }
 0x440   :  { %1772 = vmatmul.mubr.msk.bf16.vlgmr.msra.gmra.mxu0 %vm652_vm10, %v1310_v15 }
 0x441   :  { %v1372_v63 = vsel %vm572_vm2, %v1371_v40, %v1367_v5  ;;  %1782 = vmatpush3.bf16.msra.mxu0 %v2083_v11  ;;  %1783 = vmatprep.mubr.msk.bf16.mxu0 %vm1996_vm0, %v1995_v0  ;;  %v974_v14 = vpop.permute.xlu0 %973 }
 0x442   :  { %v1373_v2 = vpack.c.b16 %v1372_v63, %v1372_v63  ;;  %v1423_v41 = vpop.permute.xlu1 %1422  ;;  %1793 = vmatprep.subr.bf16.mxu0 %v1995_v0  ;;  %v1026_v27 = vrot.slane %v974_v14, %v2196_v51 }
 0x443   :  { %v1430_v6 = vrot.slane %v1423_v41, %v2196_v51 }
 0x444   :  { %1778 = vmatmul.mubr.msk.bf16.vlgmr.msra.gmra.mxu1 %vm652_vm10, %v1373_v2 }
 0x445   :  { %1788 = vmatpush3.bf16.msra.mxu1 %v2085_v12  ;;  %1789 = vmatprep.mubr.msk.bf16.mxu1 %vm1996_vm0, %v1995_v0  ;;  %v980_v45 = vpop.permute.xlu0 %979 }
 0x446   :  { %v1426_v44 = vpop.permute.xlu1 %1425  ;;  %v1035_v23 = vrot.slane %v980_v45, %v2196_v51 }
 0x447   :  { %v1434_v11 = vrot.slane %v1426_v44, %v2191_v49 }
 0x449   :  { %v1435_v9 = vsel %vm572_vm2, %v1434_v11, %v1430_v6  ;;  %v986_v22 = vpop.permute.xlu0 %985 }
 0x44a   :  { %v1436_v35 = vpack.c.b16 %v1435_v9, %v1435_v9  ;;  %v1486_v43 = vpop.permute.xlu1 %1485  ;;  %v1044_v29 = vrot.slane %v986_v22, %v2196_v51 }
 0x44b   :  { %v1493_v56 = vrot.slane %v1486_v43, %v2196_v51 }
 0x44c   :  { %1784 = vmatmul.mubr.msk.bf16.vlgmr.msra.gmra.mxu0 %vm652_vm10, %v1436_v35 }
 0x44d   :  { %1794 = vmatpush3.bf16.msra.mxu0 %v2091_v13  ;;  %1795 = vmatprep.mubr.msk.bf16.mxu0 %vm1996_vm0, %v1995_v0  ;;  %v992_v24 = vpop.permute.xlu0 %991 }
 0x44e   :  { %v1489_v12 = vpop.permute.xlu1 %1488  ;;  %v1053_v58 = vrot.slane %v992_v24, %v2196_v51 }
 0x44f   :  { %v1497_v17 = vrot.slane %v1489_v12, %v2191_v49 }
 0x451   :  { %v1498_v38 = vsel %vm572_vm2, %v1497_v17, %v1493_v56  ;;  %v998_v36 = vpop.permute.xlu0 %997 }
 0x452   :  { %v1499_v19 = vpack.c.b16 %v1498_v38, %v1498_v38  ;;  %v1552_v4 = vpop.permute.xlu1 %1551  ;;  %v1062_v7 = vrot.slane %v998_v36, %v2196_v51 }
 0x453   :  { %v1560_v55 = vrot.slane %v1552_v4, %v2191_v49 }
 0x454   :  { %1790 = vmatmul.mubr.msk.bf16.vlgmr.msra.gmra.mxu1 %vm652_vm10, %v1499_v19 }
 0x455   :  { %v1561_v13 = vsel %vm572_vm2, %v1560_v55, %v1556_v21  ;;  %v1004_v59 = vpop.permute.xlu0 %1003 }
 0x456   :  { %v1562_v60 = vpack.c.b16 %v1561_v13, %v1561_v13  ;;  %v971_v0 = vpop.permute.xlu1 %970  ;;  %v1071_v28 = vrot.slane %v1004_v59, %v2196_v51 }
 0x457   :  { %v1021_v31 = vrot.slane %v971_v0, %v2191_v49 }
 0x458   :  { %1796 = vmatmul.mubr.msk.bf16.vlgmr.msra.gmra.mxu0 %vm652_vm10, %v1562_v60 }
 0x459   :  { %v1022_v16 = vsel %vm572_vm2, %v1021_v31, %v1017_v34  ;;  %v1010_v42 = vpop.permute.xlu0 %1009 }
 0x45a   :  { %v977_v50 = vpop.permute.xlu1 %976  ;;  %v1080_v5 = vrot.slane %v1010_v42, %v2196_v51 }
 0x45b   :  { %v1030_v18 = vrot.slane %v977_v50, %v2191_v49 }
 0x45d   :  { %v1031_v37 = vsel %vm572_vm2, %v1030_v18, %v1026_v27 }
 0x45e   :  { %v983_v25 = vpop.permute.xlu1 %982  ;;  %v1086_v8 = vsel %vm637_vm3, %v1031_v37, %v1022_v16 }
 0x45f   :  { %v1039_v61 = vrot.slane %v983_v25, %v2191_v49 }
 0x461   :  { %v1040_v39 = vsel %vm572_vm2, %v1039_v61, %v1035_v23 }
 0x462   :  { %v989_v53 = vpop.permute.xlu1 %988  ;;  %v1087_v32 = vsel %vm639_vm4, %v1040_v39, %v1086_v8 }
 0x463   :  { %v1048_v48 = vrot.slane %v989_v53, %v2191_v49 }
 0x465   :  { %v1049_v54 = vsel %vm572_vm2, %v1048_v48, %v1044_v29 }
 0x466   :  { %v995_v26 = vpop.permute.xlu1 %994  ;;  %v1088_v62 = vsel %vm641_vm5, %v1049_v54, %v1087_v32 }
 0x467   :  { %v1057_v33 = vrot.slane %v995_v26, %v2191_v49 }
 0x469   :  { %v1058_v57 = vsel %vm572_vm2, %v1057_v33, %v1053_v58 }
 0x46a   :  { %v1001_v20 = vpop.permute.xlu1 %1000  ;;  %v1089_v40 = vsel %vm643_vm6, %v1058_v57, %v1088_v62 }
 0x46b   :  { %v1066_v52 = vrot.slane %v1001_v20, %v2191_v49 }
 0x46d   :  { %v1067_v1 = vsel %vm572_vm2, %v1066_v52, %v1062_v7 }
 0x46e   :  { %v1007_v46 = vpop.permute.xlu1 %1006  ;;  %v1090_v63 = vsel %vm645_vm7, %v1067_v1, %v1089_v40 }
 0x46f   :  { %v1075_v47 = vrot.slane %v1007_v46, %v2191_v49 }
 0x471   :  { %v1076_v15 = vsel %vm572_vm2, %v1075_v47, %v1071_v28 }
 0x472   :  { %v1013_v30 = vpop.permute.xlu1 %1012  ;;  %v1091_v41 = vsel %vm647_vm8, %v1076_v15, %v1090_v63 }
 0x473   :  { %v1084_v10 = vrot.slane %v1013_v30, %v2191_v49 }
 0x475   :  { %v1085_v2 = vsel %vm572_vm2, %v1084_v10, %v1080_v5 }
 0x476   :  { %v1092_v3 = vsel %vm649_vm9, %v1085_v2, %v1091_v41 }
 0x477   :  { %1094 = vst.msk [vmem:[#allocation11] sm:$0xff] %vm652_vm10, %v1092_v3 }
 0x478   :  { %1950 = shalt.err (!%p1947_p10)
}
 0x479   :  { %1650 = dma.vmem_to_hbm [thread:$0]  %s1648_s27, 128, %s2533_s8, [#allocation12]  }
 0x47a   :  { %s2000_s8 = smov [#allocation10]  }
 0x47b   :  { %s1637_s9 = sshll.u32 %s2000_s8, 4  ;;  %s1638_s9 = int_to_ptr.vmem [resolvable:$true] %s1637_s9 }
 0x47c   :  { %s1959_s10 = scalar_lea.vmem %s1638_s9, 128  ;;  %p1964_p12 = scmp.lt.s32.totalorder %s1638_s9, %s1638_s9 }
 0x47d   :  { %p1960_p11 = scmp.ne.s32.totalorder %s1638_s9, %s1959_s10  ;;  %p1965_p13 = scmp.lt.s32.totalorder %s1959_s10, %s1959_s10 }
 0x47f   :  { %p1966_p0 = por %p1965_p13, %p1964_p12 }
 0x481   :  { %p1967_p1 = pnand %p1966_p0, %p1960_p11 }
 0x4e8   :  { %v1160_v49 = vpop.f32.mrf.mxu1 }
 0x4ea   :  { %v1755_v51 = vpop.f32.mrf.mxu1 }
 0x4ec   :  { %v1163_v44 = vpop.f32.mrf.mxu1 }
 0x4ee   :  { %v1756_v6 = vpop.f32.mrf.mxu1 }
 0x4f0   :  { %v1223_v11 = vpop.f32.mrf.mxu1 }
 0x4f1   :  { %v1615_v24 = vrot.slane %v1223_v11, 7 }
 0x4f2   :  { %v1761_v9 = vpop.f32.mrf.mxu1 }
 0x4f3   :  { %v1616_v59 = vsel %vm637_vm3, %v1615_v24, %v1160_v49 }
 0x4f4   :  { %v1226_v35 = vpop.f32.mrf.mxu1 }
 0x4f6   :  { %v1762_v43 = vpop.f32.mrf.mxu1 }
 0x4f8   :  { %v1286_v14 = vpop.f32.mrf.mxu1 }
 0x4f9   :  { %v1617_v25 = vrot.slane %v1286_v14, 6 }
 0x4fa   :  { %v1767_v12 = vpop.f32.mrf.mxu1 }
 0x4fb   :  { %v1618_v20 = vsel %vm639_vm4, %v1617_v25, %v1616_v59 }
 0x4fc   :  { %v1289_v56 = vpop.f32.mrf.mxu1 }
 0x4fe   :  { %v1768_v17 = vpop.f32.mrf.mxu1 }
 0x500   :  { %v1349_v38 = vpop.f32.mrf.mxu0 }
 0x501   :  { %v1619_v36 = vrot.slane %v1349_v38, 5 }
 0x502   :  { %v1773_v45 = vpop.f32.mrf.mxu0 }
 0x503   :  { %v1620_v48 = vsel %vm641_vm5, %v1619_v36, %v1618_v20 }
 0x504   :  { %v1352_v19 = vpop.f32.mrf.mxu0  ;;  %v1412_v4 = vpop.f32.mrf.mxu1 }
 0x505   :  { %v1621_v26 = vrot.slane %v1412_v4, 4 }
 0x506   :  { %v1774_v21 = vpop.f32.mrf.mxu0  ;;  %v1779_v55 = vpop.f32.mrf.mxu1 }
 0x507   :  { %v1622_v23 = vsel %vm643_vm6, %v1621_v26, %v1620_v48 }
 0x508   :  { %v1415_v13 = vpop.f32.mrf.mxu1 }
 0x50a   :  { %v1780_v60 = vpop.f32.mrf.mxu1 }
 0x50c   :  { %v1475_v0 = vpop.f32.mrf.mxu0 }
 0x50d   :  { %v1623_v61 = vrot.slane %v1475_v0, 3 }
 0x50e   :  { %v1785_v22 = vpop.f32.mrf.mxu0 }
 0x50f   :  { %v1624_v29 = vsel %vm645_vm7, %v1623_v61, %v1622_v23 }
 0x510   :  { %v1478_v50 = vpop.f32.mrf.mxu0 }
 0x512   :  { %v1786_v53 = vpop.f32.mrf.mxu0 }
 0x514   :  { %v1538_v18 = vpop.f32.mrf.mxu1 }
 0x515   :  { %v1625_v27 = vrot.slane %v1538_v18, 2 }
 0x516   :  { %v1791_v31 = vpop.f32.mrf.mxu1 }
 0x517   :  { %v1626_v52 = vsel %vm647_vm8, %v1625_v27, %v1624_v29 }
 0x518   :  { %v1541_v33 = vpop.f32.mrf.mxu1  ;;  %v1601_v34 = vpop.f32.mrf.mxu0 }
 0x519   :  { %v1627_v37 = vrot.slane %v1601_v34, 1 }
 0x51a   :  { %v1792_v58 = vpop.f32.mrf.mxu1  ;;  %v1797_v39 = vpop.f32.mrf.mxu0 }
 0x51b   :  { %v1628_v46 = vsel %vm649_vm9, %v1627_v37, %v1626_v52 }
 0x51c   :  { %v1604_v7 = vpop.f32.mrf.mxu0  ;;  %1630 = vst.msk [vmem:[#allocation10] sm:$0xff] %vm164_vm1, %v1628_v46 }
 0x51d   :  { %1970 = shalt.err (!%p1967_p1)
}
 0x51e   :  { %1640 = dma.vmem_to_hbm [thread:$0]  %s1638_s9, 128, %s2532_s7, [#allocation4]   ;;  %v1798_v16 = vpop.f32.mrf.mxu0 }
 0x51f   :  { %1985 = dma.done.wait [#allocation4], 128  }
 0x520   :  { %1986 = vsyncadd [#allocation4], 4294967168 }
 0x521   :  { %1987 = dma.done.wait [#allocation12], 128  }
 0x522   :  { %1988 = vsyncadd [#allocation12], 4294967168 }
 0x523   :  { %1657 = vsyncpa [#allocation3], 1 }
 0x524   :  { %1658 = vsyncpa [#allocation6], 1 }
 0x525   :  { %1659 = vsyncpa [#allocation9], 1 }
 0x526   :  { %1660 = vsyncpa [#allocation4], 1 }
 0x527   :  { %1661 = vsyncpa [#allocation12], 1 }

</bundles_post_ra>
